<compile_context>
chip_gen: v5e
topology: v5e:2x2
jax: 0.10.0
libtpu: 0.0.40
codegen_flags: <defaults>
</compile_context>

<pallas_src>
import jax
import jax.numpy as jnp
from jax import lax
from jax.experimental import pallas as pl
from jax.experimental.pallas import tpu as pltpu


def qnet_kernel(x_ref, w1_ref, b1_ref, w2_ref, b2_ref, out_ref):
    # Batch-major tiles: x (TB, In) f32, w1 (H, In) f32, b1 (1, H) f32,
    #                    w2 (Out, H) f32, b2 (1, Out) f32, out (TB, Out) f32.
    # Cast MXU operands to bf16 in-kernel (f32 accumulation on the MXU).
    x = x_ref[...].astype(jnp.bfloat16)
    w1 = w1_ref[...].astype(jnp.bfloat16)
    w2 = w2_ref[...].astype(jnp.bfloat16)

    # Hidden layer: contract x's In axis with w1's In axis -> (TB, H).
    h = lax.dot_general(x, w1, (((1,), (1,)), ((), ())),
                        preferred_element_type=jnp.float32)
    h = jnp.maximum(h + b1_ref[...], 0.0)          # bias + ReLU in f32 (VPU)

    # Output layer: contract h's H axis with w2's H axis -> (TB, Out).
    o = lax.dot_general(h.astype(jnp.bfloat16), w2, (((1,), (1,)), ((), ())),
                        preferred_element_type=jnp.float32)
    out_ref[...] = (o + b2_ref[...]).astype(out_ref.dtype)


def linear_qnet_forward(x, w1, b1, w2, b2, *, max_tile=512):
    """x: (B, In) f32. Weights in PyTorch nn.Linear layout:
       w1 (H, In), b1 (H,), w2 (Out, H), b2 (Out,). Returns (B, Out) f32."""
    B, in_size = x.shape
    hidden = w1.shape[0]
    out_size = w2.shape[0]

    # One grid step when the whole batch fits comfortably in VMEM; otherwise
    # tile the batch at 512 (multiple of 8/128; ragged last block is masked
    # by Pallas, no wrapper pad needed).
    tb = B if B <= max_tile else max_tile
    grid = (pl.cdiv(B, tb),)

    b1r = b1.reshape(1, hidden).astype(jnp.float32)
    b2r = b2.reshape(1, out_size).astype(jnp.float32)

    cost = pl.CostEstimate(
        flops=2 * B * (in_size * hidden + hidden * out_size),
        bytes_accessed=(B * in_size * 4 + hidden * in_size * 4
                        + out_size * hidden * 4 + (hidden + out_size) * 4
                        + B * out_size * 4),
        transcendentals=0)

    semantics = ("parallel",) if grid[0] > 1 else ("arbitrary",)

    return pl.pallas_call(
        qnet_kernel,
        out_shape=jax.ShapeDtypeStruct((B, out_size), jnp.float32),
        grid=grid,
        in_specs=[
            pl.BlockSpec((tb, in_size), lambda i: (i, 0)),        # x tile (pipelined)
            pl.BlockSpec((hidden, in_size), lambda i: (0, 0)),    # w1, VMEM-resident
            pl.BlockSpec((1, hidden), lambda i: (0, 0)),          # b1, VMEM-resident
            pl.BlockSpec((out_size, hidden), lambda i: (0, 0)),   # w2, VMEM-resident
            pl.BlockSpec((1, out_size), lambda i: (0, 0)),        # b2, VMEM-resident
        ],
        out_specs=pl.BlockSpec((tb, out_size), lambda i: (i, 0)),
        compiler_params=pltpu.CompilerParams(dimension_semantics=semantics),
        cost_estimate=cost,
    )(x, w1, b1r, w2, b2r)


def init_params(key, input_size, hidden_size, output_size):
    # PyTorch nn.Linear layout + init: W (out, in), b (out,), U(-1/sqrt(fan_in), ...).
    k1, k2, k3, k4 = jax.random.split(key, 4)
    lim1 = 1.0 / jnp.sqrt(jnp.float32(input_size))
    lim2 = 1.0 / jnp.sqrt(jnp.float32(hidden_size))
    w1 = jax.random.uniform(k1, (hidden_size, input_size), jnp.float32, -lim1, lim1)
    b1 = jax.random.uniform(k2, (hidden_size,), jnp.float32, -lim1, lim1)
    w2 = jax.random.uniform(k3, (output_size, hidden_size), jnp.float32, -lim2, lim2)
    b2 = jax.random.uniform(k4, (output_size,), jnp.float32, -lim2, lim2)
    return w1, b1, w2, b2


if __name__ == "__main__":
    input_size, hidden_size, output_size = 16, 32, 8
    batch = 256                                     # single grid step (tb = 256)

    key = jax.random.PRNGKey(0)
    kx, kp = jax.random.split(key)
    x = jax.random.normal(kx, (batch, input_size), jnp.float32)
    w1, b1, w2, b2 = init_params(kp, input_size, hidden_size, output_size)

    out = linear_qnet_forward(x, w1, b1, w2, b2)
    jax.block_until_ready(out)

    # Pure-JAX reference mirroring the kernel's numerics (bf16 MXU inputs,
    # f32 accumulation, bf16 hidden fed into the second matmul).
    xb = x.astype(jnp.bfloat16).astype(jnp.float32)
    w1b = w1.astype(jnp.bfloat16).astype(jnp.float32)
    w2b = w2.astype(jnp.bfloat16).astype(jnp.float32)
    h = jnp.maximum(xb @ w1b.T + b1, 0.0)
    hb = h.astype(jnp.bfloat16).astype(jnp.float32)
    ref = hb @ w2b.T + b2

    assert out.shape == (batch, output_size)
    assert jnp.allclose(out, ref, atol=2e-2, rtol=2e-2), (
        float(jnp.max(jnp.abs(out - ref))))

    print("KERNEL_OK")
</pallas_src>

<mosaic_0001>
module attributes {stable_mosaic.version = 11 : i64} {
  func.func @qnet_kernel(%arg0: i32, %arg1: memref<256x16xf32, #tpu.memory_space<vmem>>, %arg2: memref<32x16xf32, #tpu.memory_space<vmem>>, %arg3: memref<1x32xf32, #tpu.memory_space<vmem>>, %arg4: memref<8x32xf32, #tpu.memory_space<vmem>>, %arg5: memref<1x8xf32, #tpu.memory_space<vmem>>, %arg6: memref<256x8xf32, #tpu.memory_space<vmem>>) attributes {dimension_semantics = [#tpu.dimension_semantics<arbitrary>], iteration_bounds = array<i64: 1>, scalar_prefetch = 0 : i64, scratch_operands = 0 : i64, tpu.core_type = #tpu.core_type<tc>, window_params = [{transform_indices = @transform_0, window_bounds = array<i64: 256, 16>}, {pipeline_mode = #tpu.pipeline_mode<synchronous>, transform_indices = @transform_1, window_bounds = array<i64: 32, 16>}, {pipeline_mode = #tpu.pipeline_mode<synchronous>, transform_indices = @transform_2, window_bounds = array<i64: 1, 32>}, {pipeline_mode = #tpu.pipeline_mode<synchronous>, transform_indices = @transform_3, window_bounds = array<i64: 8, 32>}, {pipeline_mode = #tpu.pipeline_mode<synchronous>, transform_indices = @transform_4, window_bounds = array<i64: 1, 8>}, {transform_indices = @transform_5, window_bounds = array<i64: 256, 8>}]} {
    %c0 = arith.constant 0 : index
    %c0_0 = arith.constant 0 : index
    %0 = vector.load %arg1[%c0, %c0_0] : memref<256x16xf32, #tpu.memory_space<vmem>>, vector<256x16xf32>
    %1 = arith.truncf %0 : vector<256x16xf32> to vector<256x16xbf16>
    %c0_1 = arith.constant 0 : index
    %c0_2 = arith.constant 0 : index
    %2 = vector.load %arg2[%c0_1, %c0_2] : memref<32x16xf32, #tpu.memory_space<vmem>>, vector<32x16xf32>
    %3 = arith.truncf %2 : vector<32x16xf32> to vector<32x16xbf16>
    %c0_3 = arith.constant 0 : index
    %c0_4 = arith.constant 0 : index
    %4 = vector.load %arg4[%c0_3, %c0_4] : memref<8x32xf32, #tpu.memory_space<vmem>>, vector<8x32xf32>
    %5 = arith.truncf %4 : vector<8x32xf32> to vector<8x32xbf16>
    %cst = arith.constant dense<0.000000e+00> : vector<256x32xf32>
    %6 = tpu.matmul %1, %3, %cst {dimension_numbers = #tpu.dot_dimension_numbers<[1], [1], [0], [0], [0, 0, 1, 0], [], []>} : vector<256x16xbf16>, vector<32x16xbf16>, vector<256x32xf32> -> vector<256x32xf32>
    %c0_5 = arith.constant 0 : index
    %c0_6 = arith.constant 0 : index
    %7 = vector.load %arg3[%c0_5, %c0_6] : memref<1x32xf32, #tpu.memory_space<vmem>>, vector<1x32xf32>
    %8 = vector.broadcast %7 : vector<1x32xf32> to vector<256x32xf32>
    %9 = arith.addf %6, %8 : vector<256x32xf32>
    %cst_7 = arith.constant 0.000000e+00 : f32
    %10 = vector.broadcast %cst_7 : f32 to vector<256x32xf32>
    %11 = arith.maximumf %9, %10 : vector<256x32xf32>
    %12 = arith.truncf %11 : vector<256x32xf32> to vector<256x32xbf16>
    %cst_8 = arith.constant dense<0.000000e+00> : vector<256x8xf32>
    %13 = tpu.matmul %12, %5, %cst_8 {dimension_numbers = #tpu.dot_dimension_numbers<[1], [1], [0], [0], [0, 0, 1, 0], [], []>} : vector<256x32xbf16>, vector<8x32xbf16>, vector<256x8xf32> -> vector<256x8xf32>
    %c0_9 = arith.constant 0 : index
    %c0_10 = arith.constant 0 : index
    %14 = vector.load %arg5[%c0_9, %c0_10] : memref<1x8xf32, #tpu.memory_space<vmem>>, vector<1x8xf32>
    %15 = vector.broadcast %14 : vector<1x8xf32> to vector<256x8xf32>
    %16 = arith.addf %13, %15 : vector<256x8xf32>
    %c0_11 = arith.constant 0 : index
    %c0_12 = arith.constant 0 : index
    %17 = vector.load %arg6[%c0_11, %c0_12] : memref<256x8xf32, #tpu.memory_space<vmem>>, vector<256x8xf32>
    tpu.vector_store %arg6[%c0_11, %c0_12], %16 {strides = array<i32>} : memref<256x8xf32, #tpu.memory_space<vmem>>, vector<256x8xf32>,
    return
  }
  func.func @transform_0(%arg0: i32) -> (i32, i32) {
    %c0_i32 = arith.constant 0 : i32
    %c0_i32_0 = arith.constant 0 : i32
    return %arg0, %c0_i32 : i32, i32
  }
  func.func @transform_1(%arg0: i32) -> (i32, i32) {
    %c0_i32 = arith.constant 0 : i32
    %c0_i32_0 = arith.constant 0 : i32
    %c0_i32_1 = arith.constant 0 : i32
    return %c0_i32, %c0_i32_0 : i32, i32
  }
  func.func @transform_2(%arg0: i32) -> (i32, i32) {
    %c0_i32 = arith.constant 0 : i32
    %c0_i32_0 = arith.constant 0 : i32
    %c0_i32_1 = arith.constant 0 : i32
    return %c0_i32, %c0_i32_0 : i32, i32
  }
  func.func @transform_3(%arg0: i32) -> (i32, i32) {
    %c0_i32 = arith.constant 0 : i32
    %c0_i32_0 = arith.constant 0 : i32
    %c0_i32_1 = arith.constant 0 : i32
    return %c0_i32, %c0_i32_0 : i32, i32
  }
  func.func @transform_4(%arg0: i32) -> (i32, i32) {
    %c0_i32 = arith.constant 0 : i32
    %c0_i32_0 = arith.constant 0 : i32
    %c0_i32_1 = arith.constant 0 : i32
    return %c0_i32, %c0_i32_0 : i32, i32
  }
  func.func @transform_5(%arg0: i32) -> (i32, i32) {
    %c0_i32 = arith.constant 0 : i32
    %c0_i32_0 = arith.constant 0 : i32
    return %arg0, %c0_i32 : i32, i32
  }
}

</mosaic_0001>

<bundles_post_ra>
// kernel: tpu_custom_call.1
= control target key start
LH: loop header
LB: loop body
LE: loop exit
PB: predicated region body
PF: predicated region fallthrough
CT: control target
= control target key end

     0   :  { %vm81_vm0 = vcmask 130048   ;;  %vm277_vm1 = vcmask 261120   ;;  %vm418_vm2 = vcmask 64512   ;;  %s873_s1 = inlined_call_operand.vmem [shape: f32[32,16], index: 1, kind: input, shape index: {}]   ;;  %s874_s2 = inlined_call_operand.vmem [shape: f32[1,32], index: 2, kind: input, shape index: {}]   ;;  %s875_s0 = inlined_call_operand.vmem [shape: f32[256,16], index: 0, kind: input, shape index: {}]   ;;  %s876_s3 = inlined_call_operand.vmem [shape: f32[8,32], index: 3, kind: input, shape index: {}]   ;;  %s877_s4 = inlined_call_operand.vmem [shape: f32[1,8], index: 4, kind: input, shape index: {}]   ;;  %s878_s5 = inlined_call_operand.vmem [shape: f32[256,8], index: 5, kind: output, shape index: {}]  }
   0x1   :  { %v71_v0 = vld [vmem:[%s873_s1 + $0x10] sm:$0xff]  ;;  %v72_v1 = vld [vmem:[%s873_s1 + $0x18] sm:$0xff]  ;;  %v69_v3 = vld [vmem:[%s873_s1] sm:$0xff] }
   0x2   :  { %v74_v2 = vpack.c.bf16 %v72_v1, %v71_v0  ;;  %v70_v4 = vld [vmem:[%s873_s1 + $0x8] sm:$0xff]  ;;  %v21_v8 = vld [vmem:[%s875_s0] sm:$0xff]  ;;  %v23_v14 = vld [vmem:[%s875_s0 + $0x10] sm:$0xff] }
   0x3   :  { %v73_v6 = vpack.c.bf16 %v70_v4, %v69_v3  ;;  %v22_v9 = vld [vmem:[%s875_s0 + $0x8] sm:$0xff]  ;;  %v37_v10 = vld [vmem:[%s875_s0 + $0x80] sm:$0xff]  ;;  %v24_v15 = vld [vmem:[%s875_s0 + $0x18] sm:$0xff] }
   0x4   :  { %v134_v5 = vsel %vm81_vm0, %v74_v2, 0  ;;  %v38_v11 = vld [vmem:[%s875_s0 + $0x88] sm:$0xff]  ;;  %v53_v12 = vpack.c.bf16 %v22_v9, %v21_v8  ;;  %v39_v16 = vld [vmem:[%s875_s0 + $0x90] sm:$0xff]  ;;  %v40_v17 = vld [vmem:[%s875_s0 + $0x98] sm:$0xff]  ;;  %v54_v18 = vpack.c.bf16 %v24_v15, %v23_v14 }
   0x5   :  { %142 = vmatpush.bf16.xpose.msra.mxu0 %v134_v5  ;;  %487 = vmatpush.bf16.xpose.msra.mxu2 %v134_v5  ;;  %v131_v7 = vsel %vm81_vm0, %v73_v6, 0  ;;  %v61_v13 = vpack.c.bf16 %v38_v11, %v37_v10  ;;  %v62_v19 = vpack.c.bf16 %v40_v17, %v39_v16  ;;  %v25_v20 = vld [vmem:[%s875_s0 + $0x20] sm:$0xff]  ;;  %v26_v21 = vld [vmem:[%s875_s0 + $0x28] sm:$0xff]  ;;  %v27_v26 = vld [vmem:[%s875_s0 + $0x30] sm:$0xff] }
   0x6   :  { %v41_v22 = vld [vmem:[%s875_s0 + $0xa0] sm:$0xff]  ;;  %v42_v23 = vld [vmem:[%s875_s0 + $0xa8] sm:$0xff]  ;;  %v55_v24 = vpack.c.bf16 %v26_v21, %v25_v20  ;;  %v28_v27 = vld [vmem:[%s875_s0 + $0x38] sm:$0xff] }
   0x7   :  { %v63_v25 = vpack.c.bf16 %v42_v23, %v41_v22  ;;  %v43_v28 = vld [vmem:[%s875_s0 + $0xb0] sm:$0xff]  ;;  %v44_v29 = vld [vmem:[%s875_s0 + $0xb8] sm:$0xff]  ;;  %v56_v30 = vpack.c.bf16 %v28_v27, %v27_v26  ;;  %v29_v32 = vld [vmem:[%s875_s0 + $0x40] sm:$0xff] }
   0x8   :  { %v64_v31 = vpack.c.bf16 %v44_v29, %v43_v28  ;;  %v30_v33 = vld [vmem:[%s875_s0 + $0x48] sm:$0xff]  ;;  %v45_v34 = vld [vmem:[%s875_s0 + $0xc0] sm:$0xff]  ;;  %v31_v38 = vld [vmem:[%s875_s0 + $0x50] sm:$0xff] }
   0x9   :  { %v46_v35 = vld [vmem:[%s875_s0 + $0xc8] sm:$0xff]  ;;  %v57_v36 = vpack.c.bf16 %v30_v33, %v29_v32  ;;  %v32_v39 = vld [vmem:[%s875_s0 + $0x58] sm:$0xff]  ;;  %v47_v40 = vld [vmem:[%s875_s0 + $0xd0] sm:$0xff] }
   0xa   :  { %v65_v37 = vpack.c.bf16 %v46_v35, %v45_v34  ;;  %v48_v41 = vld [vmem:[%s875_s0 + $0xd8] sm:$0xff]  ;;  %v58_v42 = vpack.c.bf16 %v32_v39, %v31_v38  ;;  %v33_v44 = vld [vmem:[%s875_s0 + $0x60] sm:$0xff]  ;;  %v34_v45 = vld [vmem:[%s875_s0 + $0x68] sm:$0xff] }
   0xb   :  { %v66_v43 = vpack.c.bf16 %v48_v41, %v47_v40  ;;  %v49_v46 = vld [vmem:[%s875_s0 + $0xe0] sm:$0xff]  ;;  %v50_v47 = vld [vmem:[%s875_s0 + $0xe8] sm:$0xff]  ;;  %v59_v48 = vpack.c.bf16 %v34_v45, %v33_v44  ;;  %v35_v53 = vld [vmem:[%s875_s0 + $0x70] sm:$0xff] }
   0xc   :  { %v67_v49 = vpack.c.bf16 %v50_v47, %v49_v46  ;;  %v75_v50 = vld [vmem:[%s876_s3] sm:$0xff]  ;;  %v36_v54 = vld [vmem:[%s875_s0 + $0x78] sm:$0xff]  ;;  %v51_v55 = vld [vmem:[%s875_s0 + $0xf0] sm:$0xff] }
   0xd   :  { %143 = vmatpush.bf16.xpose.msra.mxu0 %v131_v7  ;;  %488 = vmatpush.bf16.xpose.msra.mxu2 %v131_v7  ;;  %v76_v51 = vpack.c.bf16 %v75_v50, %v75_v50  ;;  %v52_v56 = vld [vmem:[%s875_s0 + $0xf8] sm:$0xff]  ;;  %v60_v57 = vpack.c.bf16 %v36_v54, %v35_v53  ;;  %v655_v60 = vld [vmem:[%s874_s2] ss:$0 sm:$0xff] }
   0xe   :  { %v68_v58 = vpack.c.bf16 %v52_v56, %v51_v55 }
   0xf   :  { %v327_v52 = vsel %vm277_vm1, %v76_v51, 0 }
  0x10   :  { %336 = vmatpush.bf16.xpose.msra.mxu1 %v327_v52  ;;  %489 = vmatpush.bf16.xpose.msra.mxu3 %v327_v52 }
  0x14   :  { %455 = vmatmul.msk.bf16.vlgmr.msra.gmra.mxu0 %vm81_vm0, %v53_v12  ;;  %463 = vmatmul.msk.bf16.vlgmr.msra.gmra.mxu2 %vm81_vm0, %v61_v13 }
  0x24   :  { %456 = vmatmul.msk.bf16.gmra.mxu0 %vm81_vm0, %v54_v18  ;;  %464 = vmatmul.msk.bf16.gmra.mxu2 %vm81_vm0, %v62_v19 }
  0x34   :  { %457 = vmatmul.msk.bf16.gmra.mxu0 %vm81_vm0, %v55_v24  ;;  %465 = vmatmul.msk.bf16.gmra.mxu2 %vm81_vm0, %v63_v25 }
  0x44   :  { %458 = vmatmul.msk.bf16.gmra.mxu0 %vm81_vm0, %v56_v30  ;;  %466 = vmatmul.msk.bf16.gmra.mxu2 %vm81_vm0, %v64_v31 }
  0x54   :  { %459 = vmatmul.msk.bf16.gmra.mxu0 %vm81_vm0, %v57_v36  ;;  %467 = vmatmul.msk.bf16.gmra.mxu2 %vm81_vm0, %v65_v37 }
  0x64   :  { %460 = vmatmul.msk.bf16.gmra.mxu0 %vm81_vm0, %v58_v42  ;;  %468 = vmatmul.msk.bf16.gmra.mxu2 %vm81_vm0, %v66_v43 }
  0x74   :  { %461 = vmatmul.msk.bf16.gmra.mxu0 %vm81_vm0, %v59_v48  ;;  %469 = vmatmul.msk.bf16.gmra.mxu2 %vm81_vm0, %v67_v49 }
  0x84   :  { %462 = vmatmul.msk.bf16.gmra.mxu0 %vm81_vm0, %v60_v57  ;;  %470 = vmatmul.msk.bf16.gmra.mxu2 %vm81_vm0, %v68_v58 }
  0x91   :  { %v145_v59 = vpop.f32.mrf.mxu0 }
  0x92   :  { %v146_v62 = vadd.f32 %v655_v60, %v145_v59 }
  0x94   :  { %v225_v1 = vmax.f32 %v146_v62, 0.0 }
  0x97   :  { %v185_v61 = vpop.f32.mrf.mxu2 }
  0x98   :  { %v186_v3 = vadd.f32 %v655_v60, %v185_v61 }
  0x99   :  { %v147_v63 = vpop.f32.mrf.mxu0 }
  0x9a   :  { %v148_v0 = vadd.f32 %v655_v60, %v147_v63  ;;  %v241_v8 = vmax.f32 %v186_v3, 0.0 }
  0x9c   :  { %v226_v2 = vmax.f32 %v148_v0, 0.0 }
  0x9e   :  { %v257_v4 = vpack.c.bf16 %v226_v2, %v225_v1 }
  0x9f   :  { %v187_v5 = vpop.f32.mrf.mxu2 }
  0xa0   :  { %v188_v6 = vadd.f32 %v655_v60, %v187_v5  ;;  %471 = vmatmul.msk.bf16.vlgmr.msra.gmra.mxu1 %vm277_vm1, %v257_v4 }
  0xa1   :  { %v150_v7 = vpop.f32.mrf.mxu0 }
  0xa2   :  { %v242_v9 = vmax.f32 %v188_v6, 0.0  ;;  %v151_v12 = vadd.f32 %v655_v60, %v150_v7 }
  0xa4   :  { %v662_v10 = vpack.c.bf16 %v242_v9, %v241_v8  ;;  %v227_v15 = vmax.f32 %v151_v12, 0.0 }
  0xa7   :  { %v190_v11 = vpop.f32.mrf.mxu2 }
  0xa8   :  { %v191_v17 = vadd.f32 %v655_v60, %v190_v11 }
  0xa9   :  { %v152_v13 = vpop.f32.mrf.mxu0 }
  0xaa   :  { %v153_v14 = vadd.f32 %v655_v60, %v152_v13  ;;  %v243_v22 = vmax.f32 %v191_v17, 0.0 }
  0xac   :  { %v228_v16 = vmax.f32 %v153_v14, 0.0 }
  0xae   :  { %v258_v18 = vpack.c.bf16 %v228_v16, %v227_v15 }
  0xaf   :  { %v192_v19 = vpop.f32.mrf.mxu2 }
  0xb0   :  { %v193_v20 = vadd.f32 %v655_v60, %v192_v19  ;;  %472 = vmatmul.msk.bf16.gmra.mxu1 %vm277_vm1, %v258_v18 }
  0xb1   :  { %v155_v21 = vpop.f32.mrf.mxu0 }
  0xb2   :  { %v244_v23 = vmax.f32 %v193_v20, 0.0  ;;  %v156_v26 = vadd.f32 %v655_v60, %v155_v21 }
  0xb4   :  { %v266_v24 = vpack.c.bf16 %v244_v23, %v243_v22  ;;  %v229_v29 = vmax.f32 %v156_v26, 0.0 }
  0xb6   :  { %480 = vmatmul.msk.bf16.vlgmr.msra.gmra.mxu3 %vm277_vm1, %v266_v24 }
  0xb7   :  { %v195_v25 = vpop.f32.mrf.mxu2 }
  0xb8   :  { %v196_v31 = vadd.f32 %v655_v60, %v195_v25 }
  0xb9   :  { %v157_v27 = vpop.f32.mrf.mxu0 }
  0xba   :  { %v158_v28 = vadd.f32 %v655_v60, %v157_v27  ;;  %v245_v36 = vmax.f32 %v196_v31, 0.0 }
  0xbc   :  { %v230_v30 = vmax.f32 %v158_v28, 0.0 }
  0xbe   :  { %v259_v32 = vpack.c.bf16 %v230_v30, %v229_v29 }
  0xbf   :  { %v197_v33 = vpop.f32.mrf.mxu2 }
  0xc0   :  { %v198_v34 = vadd.f32 %v655_v60, %v197_v33  ;;  %473 = vmatmul.msk.bf16.gmra.mxu1 %vm277_vm1, %v259_v32 }
  0xc1   :  { %v160_v35 = vpop.f32.mrf.mxu0 }
  0xc2   :  { %v246_v37 = vmax.f32 %v198_v34, 0.0  ;;  %v161_v40 = vadd.f32 %v655_v60, %v160_v35 }
  0xc4   :  { %v267_v38 = vpack.c.bf16 %v246_v37, %v245_v36  ;;  %v231_v43 = vmax.f32 %v161_v40, 0.0 }
  0xc6   :  { %481 = vmatmul.msk.bf16.gmra.mxu3 %vm277_vm1, %v267_v38 }
  0xc7   :  { %v200_v39 = vpop.f32.mrf.mxu2 }
  0xc8   :  { %v201_v45 = vadd.f32 %v655_v60, %v200_v39 }
  0xc9   :  { %v162_v41 = vpop.f32.mrf.mxu0 }
  0xca   :  { %v163_v42 = vadd.f32 %v655_v60, %v162_v41  ;;  %v247_v50 = vmax.f32 %v201_v45, 0.0 }
  0xcc   :  { %v232_v44 = vmax.f32 %v163_v42, 0.0 }
  0xce   :  { %v260_v46 = vpack.c.bf16 %v232_v44, %v231_v43 }
  0xcf   :  { %v202_v47 = vpop.f32.mrf.mxu2 }
  0xd0   :  { %v203_v48 = vadd.f32 %v655_v60, %v202_v47  ;;  %474 = vmatmul.msk.bf16.gmra.mxu1 %vm277_vm1, %v260_v46  ;;  %v709_v46 = vld [vmem:[%s877_s4] ss:$0 sm:$0xff] }
  0xd1   :  { %v165_v49 = vpop.f32.mrf.mxu0 }
  0xd2   :  { %v248_v51 = vmax.f32 %v203_v48, 0.0  ;;  %v166_v54 = vadd.f32 %v655_v60, %v165_v49 }
  0xd4   :  { %v268_v52 = vpack.c.bf16 %v248_v51, %v247_v50  ;;  %v233_v57 = vmax.f32 %v166_v54, 0.0 }
  0xd6   :  { %482 = vmatmul.msk.bf16.gmra.mxu3 %vm277_vm1, %v268_v52 }
  0xd7   :  { %v205_v53 = vpop.f32.mrf.mxu2 }
  0xd8   :  { %v206_v59 = vadd.f32 %v655_v60, %v205_v53 }
  0xd9   :  { %v167_v55 = vpop.f32.mrf.mxu0 }
  0xda   :  { %v168_v56 = vadd.f32 %v655_v60, %v167_v55  ;;  %v249_v1 = vmax.f32 %v206_v59, 0.0 }
  0xdc   :  { %v234_v58 = vmax.f32 %v168_v56, 0.0 }
  0xde   :  { %v261_v61 = vpack.c.bf16 %v234_v58, %v233_v57 }
  0xdf   :  { %v207_v62 = vpop.f32.mrf.mxu2 }
  0xe0   :  { %v208_v63 = vadd.f32 %v655_v60, %v207_v62  ;;  %475 = vmatmul.msk.bf16.gmra.mxu1 %vm277_vm1, %v261_v61 }
  0xe1   :  { %v170_v0 = vpop.f32.mrf.mxu0 }
  0xe2   :  { %v250_v2 = vmax.f32 %v208_v63, 0.0  ;;  %v171_v5 = vadd.f32 %v655_v60, %v170_v0 }
  0xe4   :  { %v269_v3 = vpack.c.bf16 %v250_v2, %v249_v1  ;;  %v235_v8 = vmax.f32 %v171_v5, 0.0 }
  0xe6   :  { %483 = vmatmul.msk.bf16.gmra.mxu3 %vm277_vm1, %v269_v3 }
  0xe7   :  { %v210_v4 = vpop.f32.mrf.mxu2 }
  0xe8   :  { %v211_v11 = vadd.f32 %v655_v60, %v210_v4 }
  0xe9   :  { %v172_v6 = vpop.f32.mrf.mxu0 }
  0xea   :  { %v173_v7 = vadd.f32 %v655_v60, %v172_v6  ;;  %v251_v16 = vmax.f32 %v211_v11, 0.0 }
  0xec   :  { %v236_v9 = vmax.f32 %v173_v7, 0.0 }
  0xee   :  { %v262_v12 = vpack.c.bf16 %v236_v9, %v235_v8 }
  0xef   :  { %v212_v13 = vpop.f32.mrf.mxu2 }
  0xf0   :  { %v213_v14 = vadd.f32 %v655_v60, %v212_v13  ;;  %476 = vmatmul.msk.bf16.gmra.mxu1 %vm277_vm1, %v262_v12 }
  0xf1   :  { %v175_v15 = vpop.f32.mrf.mxu0 }
  0xf2   :  { %v252_v17 = vmax.f32 %v213_v14, 0.0  ;;  %v176_v20 = vadd.f32 %v655_v60, %v175_v15 }
  0xf4   :  { %v270_v18 = vpack.c.bf16 %v252_v17, %v251_v16  ;;  %v237_v23 = vmax.f32 %v176_v20, 0.0 }
  0xf6   :  { %484 = vmatmul.msk.bf16.gmra.mxu3 %vm277_vm1, %v270_v18 }
  0xf7   :  { %v215_v19 = vpop.f32.mrf.mxu2 }
  0xf8   :  { %v216_v25 = vadd.f32 %v655_v60, %v215_v19 }
  0xf9   :  { %v177_v21 = vpop.f32.mrf.mxu0 }
  0xfa   :  { %v178_v22 = vadd.f32 %v655_v60, %v177_v21  ;;  %v253_v30 = vmax.f32 %v216_v25, 0.0 }
  0xfc   :  { %v238_v24 = vmax.f32 %v178_v22, 0.0 }
  0xfe   :  { %v263_v26 = vpack.c.bf16 %v238_v24, %v237_v23 }
  0xff   :  { %v217_v27 = vpop.f32.mrf.mxu2 }
 0x100   :  { %v218_v28 = vadd.f32 %v655_v60, %v217_v27  ;;  %477 = vmatmul.msk.bf16.gmra.mxu1 %vm277_vm1, %v263_v26 }
 0x101   :  { %v180_v29 = vpop.f32.mrf.mxu0 }
 0x102   :  { %v254_v31 = vmax.f32 %v218_v28, 0.0  ;;  %v181_v34 = vadd.f32 %v655_v60, %v180_v29 }
 0x104   :  { %v271_v32 = vpack.c.bf16 %v254_v31, %v253_v30  ;;  %v239_v37 = vmax.f32 %v181_v34, 0.0 }
 0x106   :  { %485 = vmatmul.msk.bf16.gmra.mxu3 %vm277_vm1, %v271_v32 }
 0x107   :  { %v220_v33 = vpop.f32.mrf.mxu2 }
 0x108   :  { %v221_v39 = vadd.f32 %v655_v60, %v220_v33 }
 0x109   :  { %v182_v35 = vpop.f32.mrf.mxu0 }
 0x10a   :  { %v183_v36 = vadd.f32 %v655_v60, %v182_v35  ;;  %v255_v43 = vmax.f32 %v221_v39, 0.0 }
 0x10c   :  { %v240_v38 = vmax.f32 %v183_v36, 0.0 }
 0x10e   :  { %v264_v40 = vpack.c.bf16 %v240_v38, %v239_v37 }
 0x10f   :  { %v222_v41 = vpop.f32.mrf.mxu2 }
 0x110   :  { %v223_v42 = vadd.f32 %v655_v60, %v222_v41  ;;  %478 = vmatmul.msk.bf16.gmra.mxu1 %vm277_vm1, %v264_v40 }
 0x112   :  { %v256_v44 = vmax.f32 %v223_v42, 0.0 }
 0x114   :  { %v272_v45 = vpack.c.bf16 %v256_v44, %v255_v43 }
 0x116   :  { %486 = vmatmul.msk.bf16.gmra.mxu3 %vm277_vm1, %v272_v45 }
 0x11d   :  { %v338_v47 = vpop.f32.mrf.mxu1 }
 0x11e   :  { %v339_v48 = vadd.f32 %v709_v46, %v338_v47 }
 0x120   :  { %419 = vst.msk [vmem:[%s878_s5] sm:$0xff] %vm418_vm2, %v339_v48  ;;  %479 = vmatmul.msk.bf16.gmra.mxu1 %vm277_vm1, %v662_v10 }
 0x125   :  { %v340_v60 = vpop.f32.mrf.mxu1 }
 0x126   :  { %v341_v49 = vadd.f32 %v709_v46, %v340_v60 }
 0x128   :  { %420 = vst.msk [vmem:[%s878_s5 + $0x8] sm:$0xff] %vm418_vm2, %v341_v49 }
 0x12d   :  { %v343_v50 = vpop.f32.mrf.mxu1 }
 0x12e   :  { %v344_v51 = vadd.f32 %v709_v46, %v343_v50 }
 0x130   :  { %421 = vst.msk [vmem:[%s878_s5 + $0x10] sm:$0xff] %vm418_vm2, %v344_v51 }
 0x135   :  { %v345_v52 = vpop.f32.mrf.mxu1 }
 0x136   :  { %v346_v53 = vadd.f32 %v709_v46, %v345_v52 }
 0x138   :  { %422 = vst.msk [vmem:[%s878_s5 + $0x18] sm:$0xff] %vm418_vm2, %v346_v53 }
 0x139   :  { %v383_v10 = vpop.f32.mrf.mxu3 }
 0x13a   :  { %v384_v54 = vadd.f32 %v709_v46, %v383_v10 }
 0x13c   :  { %437 = vst.msk [vmem:[%s878_s5 + $0x90] sm:$0xff] %vm418_vm2, %v384_v54 }
 0x13d   :  { %v348_v55 = vpop.f32.mrf.mxu1 }
 0x13e   :  { %v349_v56 = vadd.f32 %v709_v46, %v348_v55 }
 0x140   :  { %423 = vst.msk [vmem:[%s878_s5 + $0x20] sm:$0xff] %vm418_vm2, %v349_v56 }
 0x141   :  { %v385_v57 = vpop.f32.mrf.mxu3 }
 0x142   :  { %v386_v58 = vadd.f32 %v709_v46, %v385_v57 }
 0x144   :  { %438 = vst.msk [vmem:[%s878_s5 + $0x98] sm:$0xff] %vm418_vm2, %v386_v58 }
 0x145   :  { %v350_v59 = vpop.f32.mrf.mxu1 }
 0x146   :  { %v351_v61 = vadd.f32 %v709_v46, %v350_v59 }
 0x148   :  { %424 = vst.msk [vmem:[%s878_s5 + $0x28] sm:$0xff] %vm418_vm2, %v351_v61 }
 0x149   :  { %v388_v62 = vpop.f32.mrf.mxu3 }
 0x14a   :  { %v389_v63 = vadd.f32 %v709_v46, %v388_v62 }
 0x14c   :  { %439 = vst.msk [vmem:[%s878_s5 + $0xa0] sm:$0xff] %vm418_vm2, %v389_v63 }
 0x14d   :  { %v353_v0 = vpop.f32.mrf.mxu1 }
 0x14e   :  { %v354_v1 = vadd.f32 %v709_v46, %v353_v0 }
 0x150   :  { %425 = vst.msk [vmem:[%s878_s5 + $0x30] sm:$0xff] %vm418_vm2, %v354_v1 }
 0x151   :  { %v390_v2 = vpop.f32.mrf.mxu3 }
 0x152   :  { %v391_v3 = vadd.f32 %v709_v46, %v390_v2 }
 0x154   :  { %440 = vst.msk [vmem:[%s878_s5 + $0xa8] sm:$0xff] %vm418_vm2, %v391_v3 }
 0x155   :  { %v355_v4 = vpop.f32.mrf.mxu1 }
 0x156   :  { %v356_v5 = vadd.f32 %v709_v46, %v355_v4 }
 0x158   :  { %426 = vst.msk [vmem:[%s878_s5 + $0x38] sm:$0xff] %vm418_vm2, %v356_v5 }
 0x159   :  { %v393_v6 = vpop.f32.mrf.mxu3 }
 0x15a   :  { %v394_v7 = vadd.f32 %v709_v46, %v393_v6 }
 0x15c   :  { %441 = vst.msk [vmem:[%s878_s5 + $0xb0] sm:$0xff] %vm418_vm2, %v394_v7 }
 0x15d   :  { %v358_v8 = vpop.f32.mrf.mxu1 }
 0x15e   :  { %v359_v9 = vadd.f32 %v709_v46, %v358_v8 }
 0x160   :  { %427 = vst.msk [vmem:[%s878_s5 + $0x40] sm:$0xff] %vm418_vm2, %v359_v9 }
 0x161   :  { %v395_v11 = vpop.f32.mrf.mxu3 }
 0x162   :  { %v396_v12 = vadd.f32 %v709_v46, %v395_v11 }
 0x164   :  { %442 = vst.msk [vmem:[%s878_s5 + $0xb8] sm:$0xff] %vm418_vm2, %v396_v12 }
 0x165   :  { %v360_v13 = vpop.f32.mrf.mxu1 }
 0x166   :  { %v361_v14 = vadd.f32 %v709_v46, %v360_v13 }
 0x168   :  { %428 = vst.msk [vmem:[%s878_s5 + $0x48] sm:$0xff] %vm418_vm2, %v361_v14 }
 0x169   :  { %v398_v15 = vpop.f32.mrf.mxu3 }
 0x16a   :  { %v399_v16 = vadd.f32 %v709_v46, %v398_v15 }
 0x16c   :  { %443 = vst.msk [vmem:[%s878_s5 + $0xc0] sm:$0xff] %vm418_vm2, %v399_v16 }
 0x16d   :  { %v363_v17 = vpop.f32.mrf.mxu1 }
 0x16e   :  { %v364_v18 = vadd.f32 %v709_v46, %v363_v17 }
 0x170   :  { %429 = vst.msk [vmem:[%s878_s5 + $0x50] sm:$0xff] %vm418_vm2, %v364_v18 }
 0x171   :  { %v400_v19 = vpop.f32.mrf.mxu3 }
 0x172   :  { %v401_v20 = vadd.f32 %v709_v46, %v400_v19 }
 0x174   :  { %444 = vst.msk [vmem:[%s878_s5 + $0xc8] sm:$0xff] %vm418_vm2, %v401_v20 }
 0x175   :  { %v365_v21 = vpop.f32.mrf.mxu1 }
 0x176   :  { %v366_v22 = vadd.f32 %v709_v46, %v365_v21 }
 0x178   :  { %430 = vst.msk [vmem:[%s878_s5 + $0x58] sm:$0xff] %vm418_vm2, %v366_v22 }
 0x179   :  { %v403_v23 = vpop.f32.mrf.mxu3 }
 0x17a   :  { %v404_v24 = vadd.f32 %v709_v46, %v403_v23 }
 0x17c   :  { %445 = vst.msk [vmem:[%s878_s5 + $0xd0] sm:$0xff] %vm418_vm2, %v404_v24 }
 0x17d   :  { %v368_v25 = vpop.f32.mrf.mxu1 }
 0x17e   :  { %v369_v26 = vadd.f32 %v709_v46, %v368_v25 }
 0x180   :  { %431 = vst.msk [vmem:[%s878_s5 + $0x60] sm:$0xff] %vm418_vm2, %v369_v26 }
 0x181   :  { %v405_v27 = vpop.f32.mrf.mxu3 }
 0x182   :  { %v406_v28 = vadd.f32 %v709_v46, %v405_v27 }
 0x184   :  { %446 = vst.msk [vmem:[%s878_s5 + $0xd8] sm:$0xff] %vm418_vm2, %v406_v28 }
 0x185   :  { %v370_v29 = vpop.f32.mrf.mxu1 }
 0x186   :  { %v371_v30 = vadd.f32 %v709_v46, %v370_v29 }
 0x188   :  { %432 = vst.msk [vmem:[%s878_s5 + $0x68] sm:$0xff] %vm418_vm2, %v371_v30 }
 0x189   :  { %v408_v31 = vpop.f32.mrf.mxu3 }
 0x18a   :  { %v409_v32 = vadd.f32 %v709_v46, %v408_v31 }
 0x18c   :  { %447 = vst.msk [vmem:[%s878_s5 + $0xe0] sm:$0xff] %vm418_vm2, %v409_v32 }
 0x18d   :  { %v373_v33 = vpop.f32.mrf.mxu1 }
 0x18e   :  { %v374_v34 = vadd.f32 %v709_v46, %v373_v33 }
 0x190   :  { %433 = vst.msk [vmem:[%s878_s5 + $0x70] sm:$0xff] %vm418_vm2, %v374_v34 }
 0x191   :  { %v410_v35 = vpop.f32.mrf.mxu3 }
 0x192   :  { %v411_v36 = vadd.f32 %v709_v46, %v410_v35 }
 0x194   :  { %448 = vst.msk [vmem:[%s878_s5 + $0xe8] sm:$0xff] %vm418_vm2, %v411_v36 }
 0x195   :  { %v375_v37 = vpop.f32.mrf.mxu1 }
 0x196   :  { %v376_v38 = vadd.f32 %v709_v46, %v375_v37 }
 0x198   :  { %434 = vst.msk [vmem:[%s878_s5 + $0x78] sm:$0xff] %vm418_vm2, %v376_v38 }
 0x199   :  { %v413_v39 = vpop.f32.mrf.mxu3 }
 0x19a   :  { %v414_v40 = vadd.f32 %v709_v46, %v413_v39 }
 0x19c   :  { %449 = vst.msk [vmem:[%s878_s5 + $0xf0] sm:$0xff] %vm418_vm2, %v414_v40 }
 0x19d   :  { %v378_v41 = vpop.f32.mrf.mxu1 }
 0x19e   :  { %v379_v42 = vadd.f32 %v709_v46, %v378_v41 }
 0x1a0   :  { %435 = vst.msk [vmem:[%s878_s5 + $0x80] sm:$0xff] %vm418_vm2, %v379_v42 }
 0x1a1   :  { %v415_v43 = vpop.f32.mrf.mxu3 }
 0x1a2   :  { %v416_v44 = vadd.f32 %v709_v46, %v415_v43 }
 0x1a4   :  { %450 = vst.msk [vmem:[%s878_s5 + $0xf8] sm:$0xff] %vm418_vm2, %v416_v44 }
 0x1a5   :  { %v380_v45 = vpop.f32.mrf.mxu1 }
 0x1a6   :  { %v381_v47 = vadd.f32 %v709_v46, %v380_v45 }
 0x1a8   :  { %436 = vst.msk [vmem:[%s878_s5 + $0x88] sm:$0xff] %vm418_vm2, %v381_v47 }

</bundles_post_ra>
